<compile_context>
chip_gen: v5e
topology: v5e:2x2
jax: 0.10.0
libtpu: 0.0.40
codegen_flags: <defaults>
</compile_context>

<pallas_src>
from functools import partial

import jax
import jax.numpy as jnp
from jax.experimental import pallas as pl
from jax.experimental.pallas import tpu as pltpu

LANE = 128


# ----------------------------------------------------------------------------
# Fused kernel: all layers of the MLP for one batch element per grid step.
#   refs layout: (ts_ref, x_ref, [w_t, gain, eff_bias] * num_layers, o_ref)
# ----------------------------------------------------------------------------
def fused_mlp_kernel(ts_ref, x_ref, *refs, num_layers, relu_output):
    o_ref = refs[-1]
    layer_refs = refs[:-1]

    b = pl.program_id(0)
    t = ts_ref[b]                       # timestep for this batch element (SMEM scalar)

    h = x_ref[0]                        # (S, D_in) f32
    for li in range(num_layers):
        w_ref = layer_refs[3 * li + 0]        # (D_in_l, D_out_l)   resident in VMEM
        g_ref = layer_refs[3 * li + 1]        # (T, 1, D_out_l)     resident in VMEM
        eb_ref = layer_refs[3 * li + 2]       # (T, 1, D_out_l)     resident in VMEM

        y = jnp.dot(h, w_ref[...], preferred_element_type=jnp.float32)  # (S, D_out) MXU
        # In-kernel timestep lookup: dynamic index along the (untiled) leading axis.
        y = y * g_ref[t] + eb_ref[t]          # (1, D_out) broadcasts over S rows
        if li < num_layers - 1 or relu_output:
            y = jnp.maximum(y, 0.0)
        h = y

    o_ref[0] = h.astype(o_ref.dtype)


# ----------------------------------------------------------------------------
# TimeConditionedMLP forward (gain_bias conditioning) — one fused pallas_call.
# ----------------------------------------------------------------------------
def time_conditioned_mlp(params, x, ts, *, relu_output=False):
    """params: list of dicts with 'w' (D_out,D_in), 'b' (D_out,),
    'gain' (T,D_out), 'bias' (T,D_out).  x: (B,S,D_in) f32.  ts: (B,) int."""
    B, S, D_in = x.shape
    n = len(params)
    T = params[0]["gain"].shape[0]
    out_dim = params[-1]["w"].shape[0]
    d_out_pad = ((out_dim + LANE - 1) // LANE) * LANE   # lane-dense final output

    in_specs = [pl.BlockSpec((1, S, D_in), lambda bi, ts_r: (bi, 0, 0))]  # x
    inputs = [x]

    for li, p in enumerate(params):
        w, b, gain, bias = p["w"], p["b"], p["gain"], p["bias"]
        d_o, d_i = w.shape

        # Fold the linear bias into the per-timestep bias table (exact algebra):
        #   (x@W^T + b)*g + bias == (x@W^T)*g + (b*g + bias)
        eff_bias = b[None, :] * gain + bias                   # (T, D_out)
        w_t = jnp.transpose(w)                                # (D_in, D_out)

        if li == n - 1 and d_o < d_out_pad:
            pad = d_out_pad - d_o
            w_t = jnp.pad(w_t, ((0, 0), (0, pad)))            # zero-padded lanes
            gain = jnp.pad(gain, ((0, 0), (0, pad)))
            eff_bias = jnp.pad(eff_bias, ((0, 0), (0, pad)))
            d_o = d_out_pad

        gain3 = gain.reshape(T, 1, d_o)                       # leading axis = timestep
        eb3 = eff_bias.reshape(T, 1, d_o)

        # Constant index_maps -> fetched once, kept VMEM-resident across the grid.
        in_specs += [
            pl.BlockSpec((d_i, d_o), lambda bi, ts_r: (0, 0)),
            pl.BlockSpec((T, 1, d_o), lambda bi, ts_r: (0, 0, 0)),
            pl.BlockSpec((T, 1, d_o), lambda bi, ts_r: (0, 0, 0)),
        ]
        inputs += [w_t, gain3, eb3]

    grid_spec = pltpu.PrefetchScalarGridSpec(
        num_scalar_prefetch=1,                                # ts -> SMEM
        grid=(B,),
        in_specs=in_specs,
        out_specs=pl.BlockSpec((1, S, d_out_pad), lambda bi, ts_r: (bi, 0, 0)),
    )

    out = pl.pallas_call(
        partial(fused_mlp_kernel, num_layers=n, relu_output=relu_output),
        grid_spec=grid_spec,
        out_shape=jax.ShapeDtypeStruct((B, S, d_out_pad), jnp.float32),
        compiler_params=pltpu.CompilerParams(
            dimension_semantics=("parallel",)),               # batch split across TCs (v7x)
    )(ts.astype(jnp.int32), *inputs)

    return out[..., :out_dim]


# ----------------------------------------------------------------------------
# Parameter init mirroring the PyTorch module.
# ----------------------------------------------------------------------------
def init_params(key, num_layers, in_dim, hidden_dim, out_dim, num_timesteps):
    dims = ([in_dim] + [hidden_dim] * (num_layers - 1) + [out_dim]
            if num_layers > 1 else [in_dim, out_dim])
    params = []
    for li in range(len(dims) - 1):
        d_in, d_out = dims[li], dims[li + 1]
        bound = 1.0 / jnp.sqrt(jnp.float32(d_in))
        key, k1, k2, k3, k4 = jax.random.split(key, 5)
        params.append({
            "w": jax.random.uniform(k1, (d_out, d_in), jnp.float32, -bound, bound),
            "b": jax.random.uniform(k2, (d_out,), jnp.float32, -bound, bound),
            "gain": jax.random.uniform(k3, (num_timesteps, d_out), jnp.float32,
                                       -bound, bound),
            "bias": jax.random.uniform(k4, (num_timesteps, d_out), jnp.float32,
                                       -bound, bound),
        })
    return params


# ----------------------------------------------------------------------------
# Pure-JAX reference (mirrors the PyTorch forward exactly).
# ----------------------------------------------------------------------------
def ref_forward(params, x, ts, *, relu_output=False):
    n = len(params)
    h = x
    for i, p in enumerate(params):
        h = jnp.einsum("bsd,od->bso", h, p["w"]) + p["b"]
        g = p["gain"][ts][:, None, :]     # (B, 1, D_out) broadcast over seq
        be = p["bias"][ts][:, None, :]
        h = h * g + be
        last = (i == n - 1)
        if (not last) or relu_output:
            h = jax.nn.relu(h)
    return h


if __name__ == "__main__":
    # Config consistent with the module's forward:
    # num_layers=3, in_dim=16, hidden_dim=32, out_dim=8,
    # time_conditioning='gain_bias', num_timesteps=10, relu_output=False.
    B, S = 2, 8
    num_layers, in_dim, hidden_dim, out_dim = 3, 16, 32, 8
    num_timesteps = 10
    relu_output = False

    key = jax.random.PRNGKey(0)
    key, kx, kt, kp = jax.random.split(key, 4)

    x = jax.random.normal(kx, (B, S, in_dim), jnp.float32)
    ts = jax.random.randint(kt, (B,), 0, num_timesteps, jnp.int32)
    params = init_params(kp, num_layers, in_dim, hidden_dim, out_dim,
                         num_timesteps)

    out = time_conditioned_mlp(params, x, ts, relu_output=relu_output)
    out = jax.block_until_ready(out)

    ref = ref_forward(params, x, ts, relu_output=relu_output)
    assert out.shape == (B, S, out_dim)
    max_err = jnp.max(jnp.abs(out - ref))
    assert jnp.allclose(out, ref, atol=1e-5, rtol=1e-5), f"max abs err {max_err}"

    print("KERNEL_OK")
</pallas_src>

<mosaic_0001>
module attributes {stable_mosaic.version = 11 : i64} {
  func.func @fused_mlp_kernel(%arg0: i32, %arg1: memref<2xi32, #tpu.memory_space<smem>>, %arg2: memref<1x8x16xf32, #tpu.memory_space<vmem>>, %arg3: memref<16x32xf32, #tpu.memory_space<vmem>>, %arg4: memref<10x1x32xf32, #tpu.memory_space<vmem>>, %arg5: memref<10x1x32xf32, #tpu.memory_space<vmem>>, %arg6: memref<32x32xf32, #tpu.memory_space<vmem>>, %arg7: memref<10x1x32xf32, #tpu.memory_space<vmem>>, %arg8: memref<10x1x32xf32, #tpu.memory_space<vmem>>, %arg9: memref<32x128xf32, #tpu.memory_space<vmem>>, %arg10: memref<10x1x128xf32, #tpu.memory_space<vmem>>, %arg11: memref<10x1x128xf32, #tpu.memory_space<vmem>>, %arg12: memref<1x8x128xf32, #tpu.memory_space<vmem>>) attributes {dimension_semantics = [#tpu.dimension_semantics<parallel>], iteration_bounds = array<i64: 2>, scalar_prefetch = 1 : i64, scratch_operands = 0 : i64, tpu.core_type = #tpu.core_type<tc>, window_params = [{transform_indices = @transform_0, window_bounds = array<i64: 1, 8, 16>}, {pipeline_mode = #tpu.pipeline_mode<synchronous>, transform_indices = @transform_1, window_bounds = array<i64: 16, 32>}, {pipeline_mode = #tpu.pipeline_mode<synchronous>, transform_indices = @transform_2, window_bounds = array<i64: 10, 1, 32>}, {pipeline_mode = #tpu.pipeline_mode<synchronous>, transform_indices = @transform_3, window_bounds = array<i64: 10, 1, 32>}, {pipeline_mode = #tpu.pipeline_mode<synchronous>, transform_indices = @transform_4, window_bounds = array<i64: 32, 32>}, {pipeline_mode = #tpu.pipeline_mode<synchronous>, transform_indices = @transform_5, window_bounds = array<i64: 10, 1, 32>}, {pipeline_mode = #tpu.pipeline_mode<synchronous>, transform_indices = @transform_6, window_bounds = array<i64: 10, 1, 32>}, {pipeline_mode = #tpu.pipeline_mode<synchronous>, transform_indices = @transform_7, window_bounds = array<i64: 32, 128>}, {pipeline_mode = #tpu.pipeline_mode<synchronous>, transform_indices = @transform_8, window_bounds = array<i64: 10, 1, 128>}, {pipeline_mode = #tpu.pipeline_mode<synchronous>, transform_indices = @transform_9, window_bounds = array<i64: 10, 1, 128>}, {transform_indices = @transform_10, window_bounds = array<i64: 1, 8, 128>}]} {
    %0 = arith.index_cast %arg0 : i32 to index
    %1 = memref.load %arg1[%0] : memref<2xi32, #tpu.memory_space<smem>>
    %c0 = arith.constant 0 : index
    %c0_0 = arith.constant 0 : index
    %c0_1 = arith.constant 0 : index
    %2 = vector.load %arg2[%c0, %c0_0, %c0_1] : memref<1x8x16xf32, #tpu.memory_space<vmem>>, vector<1x8x16xf32>
    %3 = vector.shape_cast %2 : vector<1x8x16xf32> to vector<8x16xf32>
    %c0_2 = arith.constant 0 : index
    %c0_3 = arith.constant 0 : index
    %4 = vector.load %arg3[%c0_2, %c0_3] : memref<16x32xf32, #tpu.memory_space<vmem>>, vector<16x32xf32>
    %cst = arith.constant dense<0.000000e+00> : vector<8x32xf32>
    %5 = tpu.matmul %3, %4, %cst {dimension_numbers = #tpu.dot_dimension_numbers<[1], [0], [0], [1], [0, 0, 1, 1], [], []>} : vector<8x16xf32>, vector<16x32xf32>, vector<8x32xf32> -> vector<8x32xf32>
    %6 = arith.index_cast %1 : i32 to index
    %c0_4 = arith.constant 0 : index
    %c0_5 = arith.constant 0 : index
    %7 = vector.load %arg4[%6, %c0_4, %c0_5] : memref<10x1x32xf32, #tpu.memory_space<vmem>>, vector<1x1x32xf32>
    %8 = vector.shape_cast %7 : vector<1x1x32xf32> to vector<1x32xf32>
    %9 = vector.broadcast %8 : vector<1x32xf32> to vector<8x32xf32>
    %10 = arith.mulf %5, %9 : vector<8x32xf32>
    %11 = arith.index_cast %1 : i32 to index
    %c0_6 = arith.constant 0 : index
    %c0_7 = arith.constant 0 : index
    %12 = vector.load %arg5[%11, %c0_6, %c0_7] : memref<10x1x32xf32, #tpu.memory_space<vmem>>, vector<1x1x32xf32>
    %13 = vector.shape_cast %12 : vector<1x1x32xf32> to vector<1x32xf32>
    %14 = vector.broadcast %13 : vector<1x32xf32> to vector<8x32xf32>
    %15 = arith.addf %10, %14 : vector<8x32xf32>
    %cst_8 = arith.constant 0.000000e+00 : f32
    %16 = vector.broadcast %cst_8 : f32 to vector<8x32xf32>
    %17 = arith.maximumf %15, %16 : vector<8x32xf32>
    %c0_9 = arith.constant 0 : index
    %c0_10 = arith.constant 0 : index
    %18 = vector.load %arg6[%c0_9, %c0_10] : memref<32x32xf32, #tpu.memory_space<vmem>>, vector<32x32xf32>
    %cst_11 = arith.constant dense<0.000000e+00> : vector<8x32xf32>
    %19 = tpu.matmul %17, %18, %cst_11 {dimension_numbers = #tpu.dot_dimension_numbers<[1], [0], [0], [1], [0, 0, 1, 1], [], []>} : vector<8x32xf32>, vector<32x32xf32>, vector<8x32xf32> -> vector<8x32xf32>
    %20 = arith.index_cast %1 : i32 to index
    %c0_12 = arith.constant 0 : index
    %c0_13 = arith.constant 0 : index
    %21 = vector.load %arg7[%20, %c0_12, %c0_13] : memref<10x1x32xf32, #tpu.memory_space<vmem>>, vector<1x1x32xf32>
    %22 = vector.shape_cast %21 : vector<1x1x32xf32> to vector<1x32xf32>
    %23 = vector.broadcast %22 : vector<1x32xf32> to vector<8x32xf32>
    %24 = arith.mulf %19, %23 : vector<8x32xf32>
    %25 = arith.index_cast %1 : i32 to index
    %c0_14 = arith.constant 0 : index
    %c0_15 = arith.constant 0 : index
    %26 = vector.load %arg8[%25, %c0_14, %c0_15] : memref<10x1x32xf32, #tpu.memory_space<vmem>>, vector<1x1x32xf32>
    %27 = vector.shape_cast %26 : vector<1x1x32xf32> to vector<1x32xf32>
    %28 = vector.broadcast %27 : vector<1x32xf32> to vector<8x32xf32>
    %29 = arith.addf %24, %28 : vector<8x32xf32>
    %cst_16 = arith.constant 0.000000e+00 : f32
    %30 = vector.broadcast %cst_16 : f32 to vector<8x32xf32>
    %31 = arith.maximumf %29, %30 : vector<8x32xf32>
    %c0_17 = arith.constant 0 : index
    %c0_18 = arith.constant 0 : index
    %32 = vector.load %arg9[%c0_17, %c0_18] : memref<32x128xf32, #tpu.memory_space<vmem>>, vector<32x128xf32>
    %cst_19 = arith.constant dense<0.000000e+00> : vector<8x128xf32>
    %33 = tpu.matmul %31, %32, %cst_19 {dimension_numbers = #tpu.dot_dimension_numbers<[1], [0], [0], [1], [0, 0, 1, 1], [], []>} : vector<8x32xf32>, vector<32x128xf32>, vector<8x128xf32> -> vector<8x128xf32>
    %34 = arith.index_cast %1 : i32 to index
    %c0_20 = arith.constant 0 : index
    %c0_21 = arith.constant 0 : index
    %35 = vector.load %arg10[%34, %c0_20, %c0_21] : memref<10x1x128xf32, #tpu.memory_space<vmem>>, vector<1x1x128xf32>
    %36 = vector.shape_cast %35 : vector<1x1x128xf32> to vector<1x128xf32>
    %37 = vector.broadcast %36 : vector<1x128xf32> to vector<8x128xf32>
    %38 = arith.mulf %33, %37 : vector<8x128xf32>
    %39 = arith.index_cast %1 : i32 to index
    %c0_22 = arith.constant 0 : index
    %c0_23 = arith.constant 0 : index
    %40 = vector.load %arg11[%39, %c0_22, %c0_23] : memref<10x1x128xf32, #tpu.memory_space<vmem>>, vector<1x1x128xf32>
    %41 = vector.shape_cast %40 : vector<1x1x128xf32> to vector<1x128xf32>
    %42 = vector.broadcast %41 : vector<1x128xf32> to vector<8x128xf32>
    %43 = arith.addf %38, %42 : vector<8x128xf32>
    %c0_24 = arith.constant 0 : index
    %c0_25 = arith.constant 0 : index
    %c0_26 = arith.constant 0 : index
    %44 = vector.load %arg12[%c0_24, %c0_25, %c0_26] : memref<1x8x128xf32, #tpu.memory_space<vmem>>, vector<1x8x128xf32>
    %45 = vector.shape_cast %44 : vector<1x8x128xf32> to vector<8x128xf32>
    %46 = vector.shape_cast %43 : vector<8x128xf32> to vector<1x8x128xf32>
    tpu.vector_store %arg12[%c0_24, %c0_25, %c0_26], %46 {strides = array<i32>} : memref<1x8x128xf32, #tpu.memory_space<vmem>>, vector<1x8x128xf32>,
    return
  }
  func.func @transform_0(%arg0: i32, %arg1: memref<2xi32, #tpu.memory_space<smem>>) -> (i32, i32, i32) {
    %c0_i32 = arith.constant 0 : i32
    %c0_i32_0 = arith.constant 0 : i32
    %c0_i32_1 = arith.constant 0 : i32
    return %arg0, %c0_i32, %c0_i32_0 : i32, i32, i32
  }
  func.func @transform_1(%arg0: i32, %arg1: memref<2xi32, #tpu.memory_space<smem>>) -> (i32, i32) {
    %c0_i32 = arith.constant 0 : i32
    %c0_i32_0 = arith.constant 0 : i32
    %c0_i32_1 = arith.constant 0 : i32
    return %c0_i32, %c0_i32_0 : i32, i32
  }
  func.func @transform_2(%arg0: i32, %arg1: memref<2xi32, #tpu.memory_space<smem>>) -> (i32, i32, i32) {
    %c0_i32 = arith.constant 0 : i32
    %c0_i32_0 = arith.constant 0 : i32
    %c0_i32_1 = arith.constant 0 : i32
    %c0_i32_2 = arith.constant 0 : i32
    return %c0_i32, %c0_i32_0, %c0_i32_1 : i32, i32, i32
  }
  func.func @transform_3(%arg0: i32, %arg1: memref<2xi32, #tpu.memory_space<smem>>) -> (i32, i32, i32) {
    %c0_i32 = arith.constant 0 : i32
    %c0_i32_0 = arith.constant 0 : i32
    %c0_i32_1 = arith.constant 0 : i32
    %c0_i32_2 = arith.constant 0 : i32
    return %c0_i32, %c0_i32_0, %c0_i32_1 : i32, i32, i32
  }
  func.func @transform_4(%arg0: i32, %arg1: memref<2xi32, #tpu.memory_space<smem>>) -> (i32, i32) {
    %c0_i32 = arith.constant 0 : i32
    %c0_i32_0 = arith.constant 0 : i32
    %c0_i32_1 = arith.constant 0 : i32
    return %c0_i32, %c0_i32_0 : i32, i32
  }
  func.func @transform_5(%arg0: i32, %arg1: memref<2xi32, #tpu.memory_space<smem>>) -> (i32, i32, i32) {
    %c0_i32 = arith.constant 0 : i32
    %c0_i32_0 = arith.constant 0 : i32
    %c0_i32_1 = arith.constant 0 : i32
    %c0_i32_2 = arith.constant 0 : i32
    return %c0_i32, %c0_i32_0, %c0_i32_1 : i32, i32, i32
  }
  func.func @transform_6(%arg0: i32, %arg1: memref<2xi32, #tpu.memory_space<smem>>) -> (i32, i32, i32) {
    %c0_i32 = arith.constant 0 : i32
    %c0_i32_0 = arith.constant 0 : i32
    %c0_i32_1 = arith.constant 0 : i32
    %c0_i32_2 = arith.constant 0 : i32
    return %c0_i32, %c0_i32_0, %c0_i32_1 : i32, i32, i32
  }
  func.func @transform_7(%arg0: i32, %arg1: memref<2xi32, #tpu.memory_space<smem>>) -> (i32, i32) {
    %c0_i32 = arith.constant 0 : i32
    %c0_i32_0 = arith.constant 0 : i32
    %c0_i32_1 = arith.constant 0 : i32
    return %c0_i32, %c0_i32_0 : i32, i32
  }
  func.func @transform_8(%arg0: i32, %arg1: memref<2xi32, #tpu.memory_space<smem>>) -> (i32, i32, i32) {
    %c0_i32 = arith.constant 0 : i32
    %c0_i32_0 = arith.constant 0 : i32
    %c0_i32_1 = arith.constant 0 : i32
    %c0_i32_2 = arith.constant 0 : i32
    return %c0_i32, %c0_i32_0, %c0_i32_1 : i32, i32, i32
  }
  func.func @transform_9(%arg0: i32, %arg1: memref<2xi32, #tpu.memory_space<smem>>) -> (i32, i32, i32) {
    %c0_i32 = arith.constant 0 : i32
    %c0_i32_0 = arith.constant 0 : i32
    %c0_i32_1 = arith.constant 0 : i32
    %c0_i32_2 = arith.constant 0 : i32
    return %c0_i32, %c0_i32_0, %c0_i32_1 : i32, i32, i32
  }
  func.func @transform_10(%arg0: i32, %arg1: memref<2xi32, #tpu.memory_space<smem>>) -> (i32, i32, i32) {
    %c0_i32 = arith.constant 0 : i32
    %c0_i32_0 = arith.constant 0 : i32
    %c0_i32_1 = arith.constant 0 : i32
    return %arg0, %c0_i32, %c0_i32_0 : i32, i32, i32
  }
}

</mosaic_0001>

<bundles_post_ra>
// kernel: tpu_custom_call.1
= control target key start
LH: loop header
LB: loop body
LE: loop exit
PB: predicated region body
PF: predicated region fallthrough
CT: control target
= control target key end

     0   :  { %s1418_s20 = smov [#allocation3]   ;;  %s1735_s0 = inlined_call_operand.hbm [shape: s32[2], index: 0, kind: input, shape index: {}]   ;;  %s1736_s1 = inlined_call_operand.hbm [shape: f32[2,8,16], index: 1, kind: input, shape index: {}]   ;;  %s1737_s2 = inlined_call_operand.hbm [shape: f32[16,32], index: 2, kind: input, shape index: {}]   ;;  %s1738_s3 = inlined_call_operand.hbm [shape: f32[10,1,32], index: 3, kind: input, shape index: {}]   ;;  %s1739_s4 = inlined_call_operand.hbm [shape: f32[10,1,32], index: 4, kind: input, shape index: {}]   ;;  %s1740_s5 = inlined_call_operand.hbm [shape: f32[32,32], index: 5, kind: input, shape index: {}]   ;;  %s1741_s6 = inlined_call_operand.hbm [shape: f32[10,1,32], index: 6, kind: input, shape index: {}]   ;;  %s1742_s7 = inlined_call_operand.hbm [shape: f32[10,1,32], index: 7, kind: input, shape index: {}]   ;;  %s1743_s8 = inlined_call_operand.hbm [shape: f32[32,128], index: 8, kind: input, shape index: {}]   ;;  %s1744_s9 = inlined_call_operand.hbm [shape: f32[10,1,128], index: 9, kind: input, shape index: {}]   ;;  %s1745_s10 = inlined_call_operand.hbm [shape: f32[10,1,128], index: 10, kind: input, shape index: {}]   ;;  %s1746_s11 = inlined_call_operand.hbm [shape: f32[2,8,128], index: 11, kind: output, shape index: {}]  }
   0x1   :  { %1751 = sst [smem:[#allocation30_spill]] %s1737_s2  ;;  %s17_s19 = sshll.u32 %s1735_s0, 4  ;;  %s18_s19 = int_to_ptr.hbm [resolvable:$true] %s17_s19 }
   0x2   :  { %1752 = sst [smem:[#allocation31_spill]] %s1738_s3 }
   0x3   :  { %1753 = sst [smem:[#allocation32_spill]] %s1739_s4 }
   0x4   :  { %1754 = sst [smem:[#allocation33_spill]] %s1741_s6 }
   0x5   :  { %20 = dma.hbm_to_smem %s18_s19, 16, %s1418_s20, [#allocation2] }
   0x6   :  { %1372 = dma.done.wait [#allocation2], 16 }
   0x7   :  { %1373 = vsyncadd [#allocation2], 4294967280 }
   0x8   :  { %23 = sfence }
   0x9   :  { %24 = vsyncpa [#allocation5], 0 }
   0xa   :  { %26 = vsyncpa [#allocation5 + $0x1], 0 }
   0xb   :  { %27 = vsyncpa [#allocation8], 0 }
   0xc   :  { %28 = vsyncpa [#allocation11], 0 }
   0xd   :  { %29 = vsyncpa [#allocation14], 0 }
   0xe   :  { %30 = vsyncpa [#allocation17], 0 }
   0xf   :  { %31 = vsyncpa [#allocation20], 0 }
  0x10   :  { %32 = vsyncpa [#allocation6], 0 }
  0x11   :  { %34 = vsyncpa [#allocation6 + $0x1], 0  ;;  %s1495_s21 = smov 0   ;;  %s1497_s22 = smov 0  }
  0x12   :  { %s1499_s0 = smov 0   ;;  %s1501_s23 = smov 0  }
  0x13 LB: > { %s1755_s2 = sld [smem:[#allocation30_spill]]  ;;  %s1519_s27 = sadd.s32 4294967295, %s1416_s23   ;;  %s1416_s23 = sphi %s1501_s23, %s1771_s23   ;;  %s1412_s0 = sphi %s1499_s0, %s1770_s0   ;;  %s1408_s22 = sphi %s1497_s22, %s1769_s22   ;;  %s1404_s21 = sphi %s1495_s21, %s1768_s21  }
  0x14   : > { %p836_p0 = scmp.ge.s32.totalorder %s1416_s23, 1  ;;  %p61_p1 = scmp.eq.s32.totalorder %s1519_s27, 0 }
  0x15   : > { %p286_p2 = scmp.lt.s32.totalorder %s1416_s23, 3  ;;  %s1419_s29 = smov [#allocation7]  }
  0x16   : > { %s299_s30 = sshll.u32 %s1419_s29, 4  ;;  %s1758_s4 = sld [smem:[#allocation32_spill]]  ;;  %s300_s30 = int_to_ptr.vmem [resolvable:$true] %s299_s30 }
  0x17   : > { %p1524_p3 = pnand %p836_p0, %p286_p2  ;;  %s1747_s16 = smov 128  }
  0x18   : > { %s1749_s17 = smov 8   ;;  %s1422_s18 = smov [#allocation10]  }
  0x19   : > { %s297_s26 = sshll.u32 %s1755_s2, 4  ;;  %p908_p4 = pneg %p1524_p3  ;;  %s298_s26 = int_to_ptr.hbm [resolvable:$true] %s297_s26 }
  0x1a   : > { %s327_s19 = sshll.u32 %s1422_s18, 4  ;;  %s1759_s6 = sld [smem:[#allocation33_spill]]  ;;  %s328_s19 = int_to_ptr.vmem [resolvable:$true] %s327_s19 }
  0x1b   : > { %p1533_p6 = pnand %p908_p4, %p61_p1  ;;  %s1423_s29 = smov 16  }
  0x1c   : > { %s325_s15 = sshll.u32 %s1758_s4, 4  ;;  %s1424_s13 = smov 1   ;;  %s326_s15 = int_to_ptr.hbm [resolvable:$true] %s325_s15 }
  0x1d   : > { %911 = dma.hbm_to_vmem [thread:$0]  (!%p1533_p6), %s298_s26, 256, %s300_s30, [#allocation8], %s1747_s16, %s1747_s16, %s1749_s17  }
  0x1e   : > { %917 = dma.hbm_to_vmem [thread:$0]  (!%p1533_p6), %s326_s15, 160, %s328_s19, [#allocation11], %s1423_s29, %s1423_s29, %s1424_s13  }
  0x1f   : > { %s381_s26 = sshll.u32 %s1743_s8, 4  ;;  %s1425_s30 = smov [#allocation13]   ;;  %s382_s26 = int_to_ptr.hbm [resolvable:$true] %s381_s26 }
  0x20   : > { %s353_s25 = sshll.u32 %s1759_s6, 4  ;;  %s355_s18 = sshll.u32 %s1425_s30, 4  ;;  %s354_s25 = int_to_ptr.hbm [resolvable:$true] %s353_s25  ;;  %s356_s18 = int_to_ptr.vmem [resolvable:$true] %s355_s18 }
  0x21   : > { %923 = dma.hbm_to_vmem [thread:$0]  (!%p1533_p6), %s354_s25, 160, %s356_s18, [#allocation14], %s1423_s29, %s1423_s29, %s1424_s13  }
  0x22   : > { %s1426_s20 = smov [#allocation16]   ;;  %s1760_s3 = sld [smem:[#allocation31_spill]] }
  0x23   : > { %s383_s24 = sshll.u32 %s1426_s20, 4  ;;  %s1761_s2 = smov 8   ;;  %s384_s24 = int_to_ptr.vmem [resolvable:$true] %s383_s24 }
  0x24   : > { %s1762_s19 = smov 128   ;;  %s339_s4 = sshll.u32 %s1740_s5, 4  ;;  %s340_s4 = int_to_ptr.hbm [resolvable:$true] %s339_s4 }
  0x25   : > { %929 = dma.hbm_to_vmem [thread:$0]  (!%p1533_p6), %s382_s26, 512, %s384_s24, [#allocation17], %s1762_s19, %s1762_s19, %s1761_s2  }
  0x26   : > { %s1427_s6 = smov [#allocation9]   ;;  %s1428_s16 = smov [#allocation12]  }
  0x27   : > { %s313_s25 = sshll.u32 %s1427_s6, 4  ;;  %s341_s17 = sshll.u32 %s1428_s16, 4  ;;  %s314_s25 = int_to_ptr.vmem [resolvable:$true] %s313_s25  ;;  %s342_s17 = int_to_ptr.vmem [resolvable:$true] %s341_s17 }
  0x28   : > { %s311_s15 = sshll.u32 %s1760_s3, 4  ;;  %s367_s26 = sshll.u32 %s1742_s7, 4  ;;  %s312_s15 = int_to_ptr.hbm [resolvable:$true] %s311_s15  ;;  %s368_s26 = int_to_ptr.hbm [resolvable:$true] %s367_s26 }
  0x29   : > { %914 = dma.hbm_to_vmem [thread:$0]  (!%p1533_p6), %s312_s15, 160, %s314_s25, [#allocation8], %s1423_s29, %s1423_s29, %s1424_s13  }
  0x2a   : > { %920 = dma.hbm_to_vmem [thread:$0]  (!%p1533_p6), %s340_s4, 512, %s342_s17, [#allocation11], %s1762_s19, %s1762_s19, %s1761_s2  }
  0x2b   : > { %s395_s14 = sshll.u32 %s1744_s9, 4  ;;  %s1429_s15 = smov [#allocation15]   ;;  %s396_s14 = int_to_ptr.hbm [resolvable:$true] %s395_s14 }
  0x2c   : > { %s369_s30 = sshll.u32 %s1429_s15, 4  ;;  %s1430_s4 = smov [#allocation18]   ;;  %s370_s30 = int_to_ptr.vmem [resolvable:$true] %s369_s30 }
  0x2d   : > { %926 = dma.hbm_to_vmem [thread:$0]  (!%p1533_p6), %s368_s26, 160, %s370_s30, [#allocation14], %s1423_s29, %s1423_s29, %s1424_s13  }
  0x2e   : > { %s397_s2 = sshll.u32 %s1430_s4, 4  ;;  %s409_s16 = sshll.u32 %s1745_s10, 4  ;;  %s398_s2 = int_to_ptr.vmem [resolvable:$true] %s397_s2  ;;  %s410_s16 = int_to_ptr.hbm [resolvable:$true] %s409_s16 }
  0x2f   : > { %932 = dma.hbm_to_vmem [thread:$0]  (!%p1533_p6), %s396_s14, 160, %s398_s2, [#allocation17], %s1423_s29, %s1423_s29, %s1424_s13  }
  0x30   : > { %s1431_s17 = smov [#allocation19]   ;;  %s835_s20 = sadd.s32 4294967294, %s1416_s23  }
  0x31   : > { %s411_s18 = sshll.u32 %s1431_s17, 4  ;;  %s1608_s26 = sadd.s32 1, %s1416_s23   ;;  %s412_s18 = int_to_ptr.vmem [resolvable:$true] %s411_s18 }
  0x32   : > { %935 = dma.hbm_to_vmem [thread:$0]  (!%p1533_p6), %s410_s16, 160, %s412_s18, [#allocation20], %s1423_s29, %s1423_s29, %s1424_s13  }
  0x33   : > { %s47_s6 = sadd.s32 1, %s1412_s0  ;;  %s44_s24 = ssub.s32 %s1416_s23, %s1608_s26 }
  0x34   : > { %p54_p7 = scmp.ne.s32.totalorder %s1412_s0, %s1408_s22  ;;  %p45_p8 = scmp.eq.s32.totalorder %s44_s24, 0 }
  0x35   : > { %p55_p9 = scmp.eq.s32.totalorder %s1416_s23, 0  ;;  %p60_p10 = scmp.ne.s32.totalorder %s1408_s22, %s1404_s21 }
  0x36   : > { %p273_p11 = scmp.eq.s32.totalorder %s1519_s27, 1  ;;  %p279_p0 = scmp.eq.s32.totalorder %s835_s20, 1 }
  0x37   : > { %s1620_s14 = scalar_select %p45_p8, %s1412_s0, %s47_s6  }
  0x38   : > { %p1624_p12 = por %p61_p1, %p60_p10  ;;  %p1628_p13 = por %p273_p11, %p54_p7 }
  0x39   : > { %p56_p2 = por %p55_p9, %p54_p7  ;;  %s425_s13 = sand.u32 1, %s1412_s0  }
  0x3a   : > { %p1633_p4 = por %p279_p0, %p60_p10  ;;  %p953_p6 = scmp.lt.s32.totalorder %s1416_s23, 2 }
  0x3b   : > { %s847_s30 = sshll.u32 %s425_s13, 3  ;;  %s848_s4 = sshll.u32 %s1416_s23, 3 }
  0x3c   : > { %s433_s25 = scalar_lea.hbm %s1736_s1, %s848_s4  ;;  %s429_s17 = scalar_lea.vmem [#allocation4], %s847_s30 }
  0x3d   : > { %s435_s16 = sshll.u32 %s433_s25, 4  ;;  %s437_s18 = sshll.u32 %s429_s17, 4  ;;  %s436_s16 = int_to_ptr.hbm [resolvable:$true] %s435_s16  ;;  %s438_s18 = int_to_ptr.vmem [resolvable:$true] %s437_s18 }
  0x3e   : > { %p1642_p8 = pnand %p953_p6, %p56_p2  ;;  %s426_s6 = scalar_lea.sflag [#allocation5], %s425_s13 }
  0x3f   : > { %s1298_s24 = sshra.s32 %s436_s16, 4  ;;  %s1305_s30 = scalar_lea.hbm %s1736_s1, 16  ;;  %s1299_s24 = int_to_ptr.hbm [resolvable:$true] %s1298_s24 }
  0x40   : > { %s1300_s3 = scalar_lea.hbm %s1299_s24, 8  ;;  %p1302_p9 = pneg %p1642_p8 }
  0x41   : > { %p1301_p7 = scmp.ne.s32.totalorder %s1299_s24, %s1300_s3  ;;  %p1306_p0 = scmp.lt.s32.totalorder %s1299_s24, %s1736_s1 }
  0x42   : > { %p1307_p2 = scmp.lt.s32.totalorder %s1305_s30, %s1300_s3 }
  0x43   : > { %p1303_p10 = pnand %p1302_p9, %p1301_p7 }
  0x44   : > { %p1308_p6 = por %p1307_p2, %p1306_p0 }
  0x45   : > { %p1304_p11 = pneg %p1303_p10 }
  0x47   : > { %p1309_p5 = pnand %p1308_p6, %p1304_p11 }
  0x49   : > { %1312 = shalt.err (!%p1309_p5)
}
  0x4a   : > { %939 = dma.hbm_to_vmem [thread:$0]  (!%p1642_p8), %s436_s16, 128, %s438_s18, %s426_s6  }
  0x4b   : > { %446 = sbr.rel (%p1524_p3) target bundleno = 498 (0x1f2), region = 60  ;;  %s1659_s13 = sand.u32 (!%p1524_p3), 1, %s1408_s22  }
  0x4c   : > { %s850_s17 = sshll.u32 (!%p1524_p3), %s1659_s13, 3  ;;  %s449_s4 = scalar_lea.sflag (!%p1524_p3), [#allocation5], %s1659_s13 }
  0x4d   : > { %s452_s3 = scalar_lea.vmem (!%p1524_p3), [#allocation4], %s850_s17 }
  0x50   : > { %1375 = dma.done.wait (%p1624_p12), %s449_s4, 128  }
  0x51   : > { %1377 = vsyncadd (%p1624_p12), %s449_s4, 4294967168 }
  0x52   : > { %1379 = dma.done.wait (%p61_p1), [#allocation8], 416  }
  0x53   : > { %1381 = vsyncadd (%p61_p1), [#allocation8], 4294966880 }
  0x54   : > { %1383 = dma.done.wait (%p61_p1), [#allocation11], 672  }
  0x55   : > { %1385 = vsyncadd (%p61_p1), [#allocation11], 4294966624 }
  0x56   : > { %1387 = dma.done.wait (%p61_p1), [#allocation14], 320  }
  0x57   : > { %1389 = vsyncadd (%p61_p1), [#allocation14], 4294966976 }
  0x58   : > { %1391 = dma.done.wait (%p61_p1), [#allocation17], 672  }
  0x59   : > { %1393 = vsyncadd (%p61_p1), [#allocation17], 4294966624 }
  0x5a   : > { %1395 = dma.done.wait (%p61_p1), [#allocation20], 160  }
  0x5b   : > { %1397 = vsyncadd (%p61_p1), [#allocation20], 4294967136  ;;  %s1690_s28 = sld [smem:[#allocation3 + %s1519_s27]]  ;;  %v538_v0 = vld [vmem:[#allocation7 + $0x8] sm:$0xff]  ;;  %v537_v1 = vld [vmem:[#allocation7] sm:$0xff]  ;;  %vm539_vm0 = vcmask 130048  }
  0x5c   : > { %557 = vmatpush.msra.mxu0 %v538_v0  ;;  %v536_v2 = vld [vmem:[%s452_s3] sm:$0xff]  ;;  %v576_v6 = vld [vmem:[#allocation12] sm:$0xff]  ;;  %vm580_vm1 = vcmask 261120   ;;  %s865_s2 = sshll.u32 %s1519_s27, 3  ;;  %s534_s4 = scalar_lea.vmem [#allocation21], %s850_s17 }
  0x5d   : > { %v579_v3 = vld [vmem:[#allocation12 + $0x18] sm:$0xff]  ;;  %v578_v4 = vld [vmem:[#allocation12 + $0x10] sm:$0xff]  ;;  %v577_v5 = vld [vmem:[#allocation12 + $0x8] sm:$0xff]  ;;  %s668_s25 = scalar_lea.hbm %s1746_s11, %s865_s2  ;;  %s670_s3 = sshll.u32 %s534_s4, 4  ;;  %s671_s3 = int_to_ptr.vmem [resolvable:$true] %s670_s3 }
  0x5e   : > { %558 = vmatpush.msra.mxu0 %v537_v1  ;;  %596 = vmatpush.msra.mxu1 %v579_v3  ;;  %v620_v13 = vld [vmem:[#allocation16 + $0x18] sm:$0xff]  ;;  %v619_v14 = vld [vmem:[#allocation16 + $0x10] sm:$0xff]  ;;  %v618_v15 = vld [vmem:[#allocation16 + $0x8] sm:$0xff] }
  0x5f   : > { %861 = vmatmul.msk.f32.vlgmr.msra.gmra.mxu0 %vm539_vm0, %v536_v2  ;;  %636 = vmatpush.msra.mxu2 %v620_v13  ;;  %v617_v16 = vld [vmem:[#allocation16] sm:$0xff] }
  0x60   : > { %597 = vmatpush.msra.mxu1 %v578_v4 }
  0x61   : > { %s563_s12 = scalar_lea.vmem [#allocation9], %s1690_s28  ;;  %s569_s16 = scalar_lea.vmem [#allocation10], %s1690_s28  ;;  %637 = vmatpush.msra.mxu2 %v619_v14 }
  0x62   : > { %598 = vmatpush.msra.mxu1 %v577_v5  ;;  %v1010_v7 = vld [vmem:[%s563_s12] ss:$0 sm:$0xff]  ;;  %s604_s18 = scalar_lea.vmem [#allocation13], %s1690_s28  ;;  %s610_s20 = scalar_lea.vmem [#allocation15], %s1690_s28 }
  0x63   : > { %v1011_v8 = vld [vmem:[%s569_s16] ss:$0 sm:$0xff]  ;;  %638 = vmatpush.msra.mxu2 %v618_v15  ;;  %s644_s6 = scalar_lea.vmem [#allocation18], %s1690_s28  ;;  %s650_s24 = scalar_lea.vmem [#allocation19], %s1690_s28 }
  0x64   : > { %599 = vmatpush.msra.mxu1 %v576_v6  ;;  %v1012_v17 = vld [vmem:[%s604_s18] ss:$0 sm:$0xff]  ;;  %s672_s12 = sshll.u32 %s668_s25, 4  ;;  %s658_s16 = scalar_lea.sflag [#allocation6], %s1659_s13  ;;  %s673_s12 = int_to_ptr.hbm [resolvable:$true] %s672_s12 }
  0x65   : > { %639 = vmatpush.msra.mxu2 %v617_v16  ;;  %v1013_v18 = vld [vmem:[%s610_s20] ss:$0 sm:$0xff]  ;;  %s1342_s28 = sshra.s32 %s673_s12, 4  ;;  %s1343_s28 = int_to_ptr.hbm [resolvable:$true] %s1342_s28 }
  0x66   : > { %v1014_v23 = vld [vmem:[%s644_s6] ss:$0 sm:$0xff]  ;;  %s1344_s27 = scalar_lea.hbm %s1343_s28, 8  ;;  %s1348_s6 = scalar_lea.hbm %s1746_s11, 16 }
  0x67   : > { %v1015_v24 = vld [vmem:[%s650_s24] ss:$0 sm:$0xff]  ;;  %p1345_p1 = scmp.ne.s32.totalorder %s1343_s28, %s1344_s27  ;;  %p1349_p12 = scmp.lt.s32.totalorder %s1343_s28, %s1746_s11 }
  0x68   : > { %p1350_p8 = scmp.lt.s32.totalorder %s1348_s6, %s1344_s27 }
  0x69   : > { %p1346_p3 = pnand %p1345_p1, %p1628_p13 }
  0x6a   : > { %p1351_p7 = por %p1350_p8, %p1349_p12 }
  0x6b   : > { %p1347_p5 = pneg %p1346_p3 }
  0x6d   : > { %p1352_p9 = pnand %p1351_p7, %p1347_p5 }
  0xdc   : > { %v560_v9 = vpop.f32.mrf.mxu0 }
  0xdd   : > { %v568_v10 = vmul.f32 %v1010_v7, %v560_v9 }
  0xdf   : > { %v574_v11 = vadd.f32 %v1011_v8, %v568_v10 }
  0xe1   : > { %v575_v12 = vmax.f32 %v574_v11, 0.0 }
  0xe3   : > { %862 = vmatmul.msk.f32.vlgmr.msra.gmra.mxu1 %vm580_vm1, %v575_v12 }
 0x160   : > { %v601_v19 = vpop.f32.mrf.mxu1 }
 0x161   : > { %v609_v20 = vmul.f32 %v1012_v17, %v601_v19 }
 0x163   : > { %v615_v21 = vadd.f32 %v1013_v18, %v609_v20 }
 0x165   : > { %v616_v22 = vmax.f32 %v615_v21, 0.0 }
 0x167   : > { %863 = vmatmul.msk.f32.vlgmr.msra.gmra.mxu2 %vm580_vm1, %v616_v22 }
 0x1ea   : > { %v641_v25 = vpop.f32.mrf.mxu2 }
 0x1eb   : > { %v649_v26 = vmul.f32 %v1014_v23, %v641_v25 }
 0x1ed   : > { %v655_v27 = vadd.f32 %v1015_v24, %v649_v26 }
 0x1ef   : > { %656 = vst [vmem:[%s534_s4] sm:$0xff] %v655_v27 }
 0x1f0   : > { %1355 = shalt.err (!%p1352_p9)
}
 0x1f1   : > { %906 = dma.vmem_to_hbm [thread:$0]  (%p1628_p13), %s671_s3, 128, %s673_s12, %s658_s16  }
 0x1f2 PF: > { %s684_s13 = sand.u32 1, %s1404_s21   ;;  %p1767_p10 = scmp.ge.s32.totalorder %s1416_s23, 2 }
 0x1f3   : > { %s685_s2 = scalar_lea.sflag [#allocation6], %s684_s13 }
 0x1f4   : > { %p941_p11 = pnand %p1767_p10, %p1633_p4 }
 0x1f6   : > { %p942_p0 = pneg %p941_p11 }
 0x1f8   : > { %1399 = dma.done.wait (%p942_p0), %s685_s2, 128  }
 0x1f9   : > { %1401 = vsyncadd (%p942_p0), %s685_s2, 4294967168  ;;  %p37_p2 = scmp.ge.s32.totalorder %s1608_s26, 4   ;;  %s1768_s21 = smov %s1408_s22 }
 0x1fa   : > { %s1769_s22 = smov %s1412_s0  ;;  %s1770_s0 = smov %s1620_s14 }
 0x1fb   : > { %s1771_s23 = smov %s1608_s26  ;;  %39 = sbr.rel (!%p37_p2) target bundleno = 19 (0x13), region = 147 }
 0x200   :  { %691 = vsyncpa [#allocation5], 1 }
 0x201   :  { %693 = vsyncpa [#allocation5 + $0x1], 1 }
 0x202   :  { %694 = vsyncpa [#allocation8], 1 }
 0x203   :  { %695 = vsyncpa [#allocation11], 1 }
 0x204   :  { %696 = vsyncpa [#allocation14], 1 }
 0x205   :  { %697 = vsyncpa [#allocation17], 1 }
 0x206   :  { %698 = vsyncpa [#allocation20], 1 }
 0x207   :  { %699 = vsyncpa [#allocation6], 1 }
 0x208   :  { %701 = vsyncpa [#allocation6 + $0x1], 1 }

</bundles_post_ra>
